<compile_context>
chip_gen: v5e
topology: v5e:2x2
jax: 0.10.0
libtpu: 0.0.40
codegen_flags: <defaults>
</compile_context>

<pallas_src>
import jax
import jax.numpy as jnp
from jax import lax
from jax.experimental import pallas as pl

# Small synthetic shapes consistent with the module's forward.
B = 2              # batch
S = 8              # sequence length (power of two -> shift instead of div)
BS = B * S         # flattened tokens
H = 32             # backbone hidden size (ll_dim)
F = 64             # FFN intermediate size
L = 3              # num_labels (== number of heads, and each head's out dim)
V = 50             # vocab size (synthetic embedding table)
V_PAD = 64         # padded vocab rows in the slab
LANES = 128        # lane-dense width for all packed slabs
OUT_PAD = 128      # lane-dense padded output width (>= L * L)
OUT_ROWS = 8       # sublane-padded output rows (>= B) -> one full vreg store

SCALE = 1.0 / float(H) ** 0.5
NEG_BIG = -1e9
LOG2_S = S.bit_length() - 1
assert (1 << LOG2_S) == S, "S must be a power of two for the shift trick"

# ---- packed parameter slab layout (rows x 128 lanes, f32) -------------------
ROW_EMB = 0                      # [0,   64): embedding table, lanes 0:H
ROW_WQKV = ROW_EMB + V_PAD       # [64, 192): Wqkv_wide, rows 0:H real,
                                 #            lanes [Wq*SCALE | Wk | Wv | 0]
ROW_WO = ROW_WQKV + LANES        # [192,224): Wo, lanes 0:H
ROW_W1 = ROW_WO + H              # [224,256): W1, lanes 0:F
ROW_W2 = ROW_W1 + H              # [256,320): W2, lanes 0:H
ROW_HEADW = ROW_W2 + F           # [320,352): fused head weights, lanes 0:L*L
ROW_BQKV = ROW_HEADW + H         # 352: [bq|bk|bv|0] packed bias row
ROW_BO = ROW_BQKV + 1            # 353
ROW_B1 = ROW_BO + 1              # 354
ROW_B2 = ROW_B1 + 1              # 355
ROW_LN1G = ROW_B2 + 1            # 356
ROW_LN1B = ROW_LN1G + 1          # 357
ROW_LN2G = ROW_LN1B + 1          # 358
ROW_LN2B = ROW_LN2G + 1          # 359
ROW_HEADB = ROW_LN2B + 1         # 360
SLAB_ROWS = 368                  # padded to a multiple of 8 sublanes


# -----------------------------------------------------------------------------
# Single fused kernel: embedding lookup + mask build + encoder layer +
# last-token select + all classification heads.  No grid: everything fits in
# VMEM for one step (~190 KiB total payload).
# -----------------------------------------------------------------------------
def fused_forward_kernel(ids_ref, amask_ref, slab_ref, out_ref):
    ids = ids_ref[...]                           # (BS, 1) int32 token ids
    key_keep = amask_ref[...] > 0                # (1, BS) key-padding mask

    # --- embedding lookup: one-hot matmul against the in-slab table ---------
    vocab_iota = lax.broadcasted_iota(jnp.int32, (BS, V_PAD), 1)
    onehot = (vocab_iota == ids).astype(jnp.float32)            # (BS, V_PAD)
    x_wide = jnp.dot(onehot, slab_ref[ROW_EMB:ROW_EMB + V_PAD, :],
                     preferred_element_type=jnp.float32)        # (BS, 128)

    # --- fused Q/K/V projection: one 128-wide matmul + one (1,128) bias add --
    # (1/sqrt(H) is folded into Wq at init time.)
    qkv = (jnp.dot(x_wide, slab_ref[ROW_WQKV:ROW_WQKV + LANES, :],
                   preferred_element_type=jnp.float32)
           + slab_ref[ROW_BQKV:ROW_BQKV + 1, :])                # (BS, 128)
    q = qkv[:, 0:H]
    k = qkv[:, H:2 * H]
    v = qkv[:, 2 * H:3 * H]

    # --- attention scores with in-kernel block-diagonal + padding mask -------
    scores = lax.dot_general(q, k, (((1,), (1,)), ((), ())),
                             preferred_element_type=jnp.float32)  # (BS, BS)
    row_b = lax.broadcasted_iota(jnp.int32, (BS, BS), 0) >> LOG2_S
    col_b = lax.broadcasted_iota(jnp.int32, (BS, BS), 1) >> LOG2_S
    allow = jnp.logical_and(row_b == col_b, key_keep)
    scores = jnp.where(allow, scores, NEG_BIG)

    scores = scores - jnp.max(scores, axis=-1, keepdims=True)
    p = jnp.exp(scores)
    p = p * pl.reciprocal(jnp.sum(p, axis=-1, keepdims=True), approx=True)

    attn = jnp.dot(p, v, preferred_element_type=jnp.float32)     # (BS, H)
    x = x_wide[:, 0:H]
    y = (jnp.dot(attn, slab_ref[ROW_WO:ROW_WO + H, 0:H],
                 preferred_element_type=jnp.float32)
         + slab_ref[ROW_BO:ROW_BO + 1, 0:H]
         + x)                                                    # residual

    # --- layernorm 1 ----------------------------------------------------------
    mu = jnp.mean(y, axis=-1, keepdims=True)
    var = jnp.mean((y - mu) ** 2, axis=-1, keepdims=True)
    y = ((y - mu) * lax.rsqrt(var + 1e-5)
         * slab_ref[ROW_LN1G:ROW_LN1G + 1, 0:H]
         + slab_ref[ROW_LN1B:ROW_LN1B + 1, 0:H])

    # --- feed-forward ---------------------------------------------------------
    h = (jnp.dot(y, slab_ref[ROW_W1:ROW_W1 + H, 0:F],
                 preferred_element_type=jnp.float32)
         + slab_ref[ROW_B1:ROW_B1 + 1, 0:F])
    h = jnp.maximum(h, 0.0)
    ff = (jnp.dot(h, slab_ref[ROW_W2:ROW_W2 + F, 0:H],
                  preferred_element_type=jnp.float32)
          + slab_ref[ROW_B2:ROW_B2 + 1, 0:H])
    z = y + ff                                                   # residual

    # --- layernorm 2 ----------------------------------------------------------
    mu2 = jnp.mean(z, axis=-1, keepdims=True)
    var2 = jnp.mean((z - mu2) ** 2, axis=-1, keepdims=True)
    z = ((z - mu2) * lax.rsqrt(var2 + 1e-5)
         * slab_ref[ROW_LN2G:ROW_LN2G + 1, 0:H]
         + slab_ref[ROW_LN2B:ROW_LN2B + 1, 0:H])                 # (BS, H)

    # --- last token of each batch: static sublane row slices, pad to 8 rows --
    rows = [z[b * S + S - 1: b * S + S, :] for b in range(B)]
    rows.append(jnp.zeros((OUT_ROWS - B, H), jnp.float32))
    emb8 = jnp.concatenate(rows, axis=0)                         # (8, H)

    # --- all num_labels heads fused: lane-dense (8,128) unmasked store -------
    out_ref[...] = (jnp.dot(emb8, slab_ref[ROW_HEADW:ROW_HEADW + H, :],
                            preferred_element_type=jnp.float32)
                    + slab_ref[ROW_HEADB:ROW_HEADB + 1, :])      # (8, OUT_PAD)


def _cost_estimate():
    flops = 2 * (BS * V_PAD * LANES        # one-hot embedding matmul
                 + BS * LANES * LANES      # fused qkv projection
                 + BS * BS * H             # q @ k^T
                 + BS * BS * H             # p @ v
                 + BS * H * H              # attention output projection
                 + BS * H * F              # FFN up
                 + BS * F * H              # FFN down
                 + OUT_ROWS * H * OUT_PAD)  # fused heads
    transcendentals = BS * BS + 3 * BS     # exp + rsqrt + approx reciprocal
    bytes_accessed = 4 * (BS + BS + SLAB_ROWS * LANES + OUT_ROWS * OUT_PAD)
    return pl.CostEstimate(flops=flops, transcendentals=transcendentals,
                           bytes_accessed=bytes_accessed)


def run_fused_forward(ids, amask, slab):
    """ids: [BS,1] i32, amask: [1,BS] i32, slab: [SLAB_ROWS,128] f32."""
    return pl.pallas_call(
        fused_forward_kernel,
        out_shape=jax.ShapeDtypeStruct((OUT_ROWS, OUT_PAD), jnp.float32),
        cost_estimate=_cost_estimate(),
    )(ids, amask, slab)


# -----------------------------------------------------------------------------
# Parameter init (deterministic, synthetic — no checkpoint loading).
# -----------------------------------------------------------------------------
def init_params(key):
    ks = jax.random.split(key, 9)
    scale = 0.05

    emb_table = scale * jax.random.normal(ks[0], (V, H), jnp.float32)
    wq = scale * jax.random.normal(ks[1], (H, H), jnp.float32) * SCALE  # fold
    wk = scale * jax.random.normal(ks[2], (H, H), jnp.float32)
    wv = scale * jax.random.normal(ks[3], (H, H), jnp.float32)
    wo = scale * jax.random.normal(ks[4], (H, H), jnp.float32)
    w1 = scale * jax.random.normal(ks[5], (H, F), jnp.float32)
    w2 = scale * jax.random.normal(ks[6], (F, H), jnp.float32)
    # stacked heads: for i in range(num_labels): Linear(H, num_labels)
    head_w = scale * jax.random.normal(ks[7], (L, H, L), jnp.float32)
    head_b = scale * jax.random.normal(ks[8], (L, L), jnp.float32)

    slab = jnp.zeros((SLAB_ROWS, LANES), jnp.float32)
    slab = slab.at[ROW_EMB:ROW_EMB + V, 0:H].set(emb_table)
    slab = slab.at[ROW_WQKV:ROW_WQKV + H, 0:H].set(wq)
    slab = slab.at[ROW_WQKV:ROW_WQKV + H, H:2 * H].set(wk)
    slab = slab.at[ROW_WQKV:ROW_WQKV + H, 2 * H:3 * H].set(wv)
    slab = slab.at[ROW_WO:ROW_WO + H, 0:H].set(wo)
    slab = slab.at[ROW_W1:ROW_W1 + H, 0:F].set(w1)
    slab = slab.at[ROW_W2:ROW_W2 + F, 0:H].set(w2)
    slab = slab.at[ROW_HEADW:ROW_HEADW + H, 0:L * L].set(
        jnp.transpose(head_w, (1, 0, 2)).reshape(H, L * L))
    # projection / FFN biases are zero; LN gains are one, betas zero.
    slab = slab.at[ROW_LN1G, 0:H].set(1.0)
    slab = slab.at[ROW_LN2G, 0:H].set(1.0)
    slab = slab.at[ROW_HEADB, 0:L * L].set(head_b.reshape(L * L))
    return {"slab": slab}


# -----------------------------------------------------------------------------
# Forward: mirrors TransformerClassIrredLoss.forward
# -----------------------------------------------------------------------------
def forward(params, input_ids, attention_mask):
    ids = input_ids.reshape(BS, 1).astype(jnp.int32)
    amask = attention_mask.reshape(1, BS).astype(jnp.int32)
    stacked = run_fused_forward(ids, amask, params["slab"])     # (8, OUT_PAD)
    logits = stacked[:B, :]
    # Return a list of [B, num_labels] tensors, like the PyTorch module.
    return [logits[:, i * L:(i + 1) * L] for i in range(L)]


if __name__ == "__main__":
    key = jax.random.PRNGKey(0)
    pkey, ikey = jax.random.split(key)
    params = init_params(pkey)

    input_ids = jax.random.randint(ikey, (B, S), 0, V, dtype=jnp.int32)
    attention_mask = jnp.ones((B, S), dtype=jnp.int32)

    forward_jit = jax.jit(forward)
    outputs = forward_jit(params, input_ids, attention_mask)
    outputs = [jax.block_until_ready(o) for o in outputs]

    assert len(outputs) == L
    for o in outputs:
        assert o.shape == (B, L), o.shape
        assert o.dtype == jnp.float32
        assert bool(jnp.all(jnp.isfinite(o)))

    print("KERNEL_OK")
</pallas_src>

<mosaic_0001>
module attributes {stable_mosaic.version = 11 : i64} {
  func.func @fused_forward_kernel(%arg0: memref<16x1xi32, #tpu.memory_space<vmem>>, %arg1: memref<1x16xi32, #tpu.memory_space<vmem>>, %arg2: memref<368x128xf32, #tpu.memory_space<vmem>>, %arg3: memref<8x128xf32, #tpu.memory_space<vmem>>) attributes {dimension_semantics = [], scalar_prefetch = 0 : i64, scratch_operands = 0 : i64, tpu.core_type = #tpu.core_type<tc>} {
    %c0 = arith.constant 0 : index
    %c0_0 = arith.constant 0 : index
    %0 = vector.load %arg0[%c0, %c0_0] : memref<16x1xi32, #tpu.memory_space<vmem>>, vector<16x1xi32>
    %c0_1 = arith.constant 0 : index
    %c0_2 = arith.constant 0 : index
    %1 = vector.load %arg1[%c0_1, %c0_2] : memref<1x16xi32, #tpu.memory_space<vmem>>, vector<1x16xi32>
    %c0_i32 = arith.constant 0 : i32
    %2 = vector.broadcast %c0_i32 : i32 to vector<1x16xi32>
    %3 = arith.cmpi sgt, %1, %2 : vector<1x16xi32>
    %4 = tpu.iota {dimensions = array<i32: 1>} : vector<16x64xi32>
    %5 = vector.broadcast %0 : vector<16x1xi32> to vector<16x64xi32>
    %6 = arith.cmpi eq, %4, %5 : vector<16x64xi32>
    %7 = arith.extui %6 : vector<16x64xi1> to vector<16x64xi32>
    %8 = arith.sitofp %7 : vector<16x64xi32> to vector<16x64xf32>
    %c0_3 = arith.constant 0 : index
    %c0_4 = arith.constant 0 : index
    %9 = vector.load %arg2[%c0_3, %c0_4] : memref<368x128xf32, #tpu.memory_space<vmem>>, vector<64x128xf32>
    %cst = arith.constant dense<0.000000e+00> : vector<16x128xf32>
    %10 = tpu.matmul %8, %9, %cst {dimension_numbers = #tpu.dot_dimension_numbers<[1], [0], [0], [1], [0, 0, 1, 1], [], []>} : vector<16x64xf32>, vector<64x128xf32>, vector<16x128xf32> -> vector<16x128xf32>
    %c64 = arith.constant 64 : index
    %c0_5 = arith.constant 0 : index
    %11 = vector.load %arg2[%c64, %c0_5] : memref<368x128xf32, #tpu.memory_space<vmem>>, vector<128x128xf32>
    %cst_6 = arith.constant dense<0.000000e+00> : vector<16x128xf32>
    %12 = tpu.matmul %10, %11, %cst_6 {dimension_numbers = #tpu.dot_dimension_numbers<[1], [0], [0], [1], [0, 0, 1, 1], [], []>} : vector<16x128xf32>, vector<128x128xf32>, vector<16x128xf32> -> vector<16x128xf32>
    %c352 = arith.constant 352 : index
    %c0_7 = arith.constant 0 : index
    %13 = vector.load %arg2[%c352, %c0_7] : memref<368x128xf32, #tpu.memory_space<vmem>>, vector<1x128xf32>
    %14 = vector.broadcast %13 : vector<1x128xf32> to vector<16x128xf32>
    %15 = arith.addf %12, %14 : vector<16x128xf32>
    %16 = vector.extract_strided_slice %15 {offsets = [0, 0], sizes = [16, 32], strides = [1, 1]} : vector<16x128xf32> to vector<16x32xf32>
    %17 = vector.extract_strided_slice %15 {offsets = [0, 32], sizes = [16, 32], strides = [1, 1]} : vector<16x128xf32> to vector<16x32xf32>
    %18 = vector.extract_strided_slice %15 {offsets = [0, 64], sizes = [16, 32], strides = [1, 1]} : vector<16x128xf32> to vector<16x32xf32>
    %cst_8 = arith.constant dense<0.000000e+00> : vector<16x16xf32>
    %19 = tpu.matmul %16, %17, %cst_8 {dimension_numbers = #tpu.dot_dimension_numbers<[1], [1], [0], [0], [0, 0, 1, 0], [], []>} : vector<16x32xf32>, vector<16x32xf32>, vector<16x16xf32> -> vector<16x16xf32>
    %20 = tpu.iota {dimensions = array<i32: 0>} : vector<16x16xi32>
    %c3_i32 = arith.constant 3 : i32
    %21 = vector.broadcast %c3_i32 : i32 to vector<16x16xi32>
    %22 = arith.shrsi %20, %21 : vector<16x16xi32>
    %23 = tpu.iota {dimensions = array<i32: 1>} : vector<16x16xi32>
    %c3_i32_9 = arith.constant 3 : i32
    %24 = vector.broadcast %c3_i32_9 : i32 to vector<16x16xi32>
    %25 = arith.shrsi %23, %24 : vector<16x16xi32>
    %26 = arith.cmpi eq, %22, %25 : vector<16x16xi32>
    %27 = vector.broadcast %3 : vector<1x16xi1> to vector<16x16xi1>
    %28 = arith.andi %26, %27 : vector<16x16xi1>
    %cst_10 = arith.constant -1.000000e+09 : f32
    %29 = vector.broadcast %cst_10 : f32 to vector<16x16xf32>
    %30 = arith.select %28, %19, %29 : vector<16x16xi1>, vector<16x16xf32>
    %cst_11 = arith.constant dense<0xFF800000> : vector<16xf32>
    %31 = vector.multi_reduction <maximumf>, %30, %cst_11 [1] : vector<16x16xf32> to vector<16xf32>
    %32 = vector.shape_cast %31 : vector<16xf32> to vector<16x1xf32>
    %33 = vector.broadcast %32 : vector<16x1xf32> to vector<16x16xf32>
    %34 = arith.subf %30, %33 : vector<16x16xf32>
    %35 = math.exp %34 : vector<16x16xf32>
    %cst_12 = arith.constant dense<0.000000e+00> : vector<16xf32>
    %36 = vector.multi_reduction <add>, %35, %cst_12 [1] : vector<16x16xf32> to vector<16xf32>
    %37 = vector.shape_cast %36 : vector<16xf32> to vector<16x1xf32>
    %38 = tpu.reciprocal %37 {approx = true} : vector<16x1xf32> -> vector<16x1xf32>
    %39 = vector.broadcast %38 : vector<16x1xf32> to vector<16x16xf32>
    %40 = arith.mulf %35, %39 : vector<16x16xf32>
    %cst_13 = arith.constant dense<0.000000e+00> : vector<16x32xf32>
    %41 = tpu.matmul %40, %18, %cst_13 {dimension_numbers = #tpu.dot_dimension_numbers<[1], [0], [0], [1], [0, 0, 1, 1], [], []>} : vector<16x16xf32>, vector<16x32xf32>, vector<16x32xf32> -> vector<16x32xf32>
    %42 = vector.extract_strided_slice %10 {offsets = [0, 0], sizes = [16, 32], strides = [1, 1]} : vector<16x128xf32> to vector<16x32xf32>
    %c192 = arith.constant 192 : index
    %c0_14 = arith.constant 0 : index
    %43 = vector.load %arg2[%c192, %c0_14] : memref<368x128xf32, #tpu.memory_space<vmem>>, vector<32x32xf32>
    %cst_15 = arith.constant dense<0.000000e+00> : vector<16x32xf32>
    %44 = tpu.matmul %41, %43, %cst_15 {dimension_numbers = #tpu.dot_dimension_numbers<[1], [0], [0], [1], [0, 0, 1, 1], [], []>} : vector<16x32xf32>, vector<32x32xf32>, vector<16x32xf32> -> vector<16x32xf32>
    %c353 = arith.constant 353 : index
    %c0_16 = arith.constant 0 : index
    %45 = vector.load %arg2[%c353, %c0_16] : memref<368x128xf32, #tpu.memory_space<vmem>>, vector<1x32xf32>
    %46 = vector.broadcast %45 : vector<1x32xf32> to vector<16x32xf32>
    %47 = arith.addf %44, %46 : vector<16x32xf32>
    %48 = arith.addf %47, %42 : vector<16x32xf32>
    %cst_17 = arith.constant dense<0.000000e+00> : vector<16xf32>
    %49 = vector.multi_reduction <add>, %48, %cst_17 [1] : vector<16x32xf32> to vector<16xf32>
    %50 = vector.shape_cast %49 : vector<16xf32> to vector<16x1xf32>
    %cst_18 = arith.constant 3.200000e+01 : f32
    %51 = vector.broadcast %cst_18 : f32 to vector<16x1xf32>
    %52 = arith.divf %50, %51 : vector<16x1xf32>
    %53 = vector.broadcast %52 : vector<16x1xf32> to vector<16x32xf32>
    %54 = arith.subf %48, %53 : vector<16x32xf32>
    %55 = arith.mulf %54, %54 : vector<16x32xf32>
    %cst_19 = arith.constant dense<0.000000e+00> : vector<16xf32>
    %56 = vector.multi_reduction <add>, %55, %cst_19 [1] : vector<16x32xf32> to vector<16xf32>
    %57 = vector.shape_cast %56 : vector<16xf32> to vector<16x1xf32>
    %cst_20 = arith.constant 3.200000e+01 : f32
    %58 = vector.broadcast %cst_20 : f32 to vector<16x1xf32>
    %59 = arith.divf %57, %58 : vector<16x1xf32>
    %60 = vector.broadcast %52 : vector<16x1xf32> to vector<16x32xf32>
    %61 = arith.subf %48, %60 : vector<16x32xf32>
    %cst_21 = arith.constant 9.99999974E-6 : f32
    %62 = vector.broadcast %cst_21 : f32 to vector<16x1xf32>
    %63 = arith.addf %59, %62 : vector<16x1xf32>
    %64 = math.rsqrt %63 : vector<16x1xf32>
    %65 = vector.broadcast %64 : vector<16x1xf32> to vector<16x32xf32>
    %66 = arith.mulf %61, %65 : vector<16x32xf32>
    %c356 = arith.constant 356 : index
    %c0_22 = arith.constant 0 : index
    %67 = vector.load %arg2[%c356, %c0_22] : memref<368x128xf32, #tpu.memory_space<vmem>>, vector<1x32xf32>
    %68 = vector.broadcast %67 : vector<1x32xf32> to vector<16x32xf32>
    %69 = arith.mulf %66, %68 : vector<16x32xf32>
    %c357 = arith.constant 357 : index
    %c0_23 = arith.constant 0 : index
    %70 = vector.load %arg2[%c357, %c0_23] : memref<368x128xf32, #tpu.memory_space<vmem>>, vector<1x32xf32>
    %71 = vector.broadcast %70 : vector<1x32xf32> to vector<16x32xf32>
    %72 = arith.addf %69, %71 : vector<16x32xf32>
    %c224 = arith.constant 224 : index
    %c0_24 = arith.constant 0 : index
    %73 = vector.load %arg2[%c224, %c0_24] : memref<368x128xf32, #tpu.memory_space<vmem>>, vector<32x64xf32>
    %cst_25 = arith.constant dense<0.000000e+00> : vector<16x64xf32>
    %74 = tpu.matmul %72, %73, %cst_25 {dimension_numbers = #tpu.dot_dimension_numbers<[1], [0], [0], [1], [0, 0, 1, 1], [], []>} : vector<16x32xf32>, vector<32x64xf32>, vector<16x64xf32> -> vector<16x64xf32>
    %c354 = arith.constant 354 : index
    %c0_26 = arith.constant 0 : index
    %75 = vector.load %arg2[%c354, %c0_26] : memref<368x128xf32, #tpu.memory_space<vmem>>, vector<1x64xf32>
    %76 = vector.broadcast %75 : vector<1x64xf32> to vector<16x64xf32>
    %77 = arith.addf %74, %76 : vector<16x64xf32>
    %cst_27 = arith.constant 0.000000e+00 : f32
    %78 = vector.broadcast %cst_27 : f32 to vector<16x64xf32>
    %79 = arith.maximumf %77, %78 : vector<16x64xf32>
    %c256 = arith.constant 256 : index
    %c0_28 = arith.constant 0 : index
    %80 = vector.load %arg2[%c256, %c0_28] : memref<368x128xf32, #tpu.memory_space<vmem>>, vector<64x32xf32>
    %cst_29 = arith.constant dense<0.000000e+00> : vector<16x32xf32>
    %81 = tpu.matmul %79, %80, %cst_29 {dimension_numbers = #tpu.dot_dimension_numbers<[1], [0], [0], [1], [0, 0, 1, 1], [], []>} : vector<16x64xf32>, vector<64x32xf32>, vector<16x32xf32> -> vector<16x32xf32>
    %c355 = arith.constant 355 : index
    %c0_30 = arith.constant 0 : index
    %82 = vector.load %arg2[%c355, %c0_30] : memref<368x128xf32, #tpu.memory_space<vmem>>, vector<1x32xf32>
    %83 = vector.broadcast %82 : vector<1x32xf32> to vector<16x32xf32>
    %84 = arith.addf %81, %83 : vector<16x32xf32>
    %85 = arith.addf %72, %84 : vector<16x32xf32>
    %cst_31 = arith.constant dense<0.000000e+00> : vector<16xf32>
    %86 = vector.multi_reduction <add>, %85, %cst_31 [1] : vector<16x32xf32> to vector<16xf32>
    %87 = vector.shape_cast %86 : vector<16xf32> to vector<16x1xf32>
    %cst_32 = arith.constant 3.200000e+01 : f32
    %88 = vector.broadcast %cst_32 : f32 to vector<16x1xf32>
    %89 = arith.divf %87, %88 : vector<16x1xf32>
    %90 = vector.broadcast %89 : vector<16x1xf32> to vector<16x32xf32>
    %91 = arith.subf %85, %90 : vector<16x32xf32>
    %92 = arith.mulf %91, %91 : vector<16x32xf32>
    %cst_33 = arith.constant dense<0.000000e+00> : vector<16xf32>
    %93 = vector.multi_reduction <add>, %92, %cst_33 [1] : vector<16x32xf32> to vector<16xf32>
    %94 = vector.shape_cast %93 : vector<16xf32> to vector<16x1xf32>
    %cst_34 = arith.constant 3.200000e+01 : f32
    %95 = vector.broadcast %cst_34 : f32 to vector<16x1xf32>
    %96 = arith.divf %94, %95 : vector<16x1xf32>
    %97 = vector.broadcast %89 : vector<16x1xf32> to vector<16x32xf32>
    %98 = arith.subf %85, %97 : vector<16x32xf32>
    %cst_35 = arith.constant 9.99999974E-6 : f32
    %99 = vector.broadcast %cst_35 : f32 to vector<16x1xf32>
    %100 = arith.addf %96, %99 : vector<16x1xf32>
    %101 = math.rsqrt %100 : vector<16x1xf32>
    %102 = vector.broadcast %101 : vector<16x1xf32> to vector<16x32xf32>
    %103 = arith.mulf %98, %102 : vector<16x32xf32>
    %c358 = arith.constant 358 : index
    %c0_36 = arith.constant 0 : index
    %104 = vector.load %arg2[%c358, %c0_36] : memref<368x128xf32, #tpu.memory_space<vmem>>, vector<1x32xf32>
    %105 = vector.broadcast %104 : vector<1x32xf32> to vector<16x32xf32>
    %106 = arith.mulf %103, %105 : vector<16x32xf32>
    %c359 = arith.constant 359 : index
    %c0_37 = arith.constant 0 : index
    %107 = vector.load %arg2[%c359, %c0_37] : memref<368x128xf32, #tpu.memory_space<vmem>>, vector<1x32xf32>
    %108 = vector.broadcast %107 : vector<1x32xf32> to vector<16x32xf32>
    %109 = arith.addf %106, %108 : vector<16x32xf32>
    %110 = vector.extract_strided_slice %109 {offsets = [7, 0], sizes = [1, 32], strides = [1, 1]} : vector<16x32xf32> to vector<1x32xf32>
    %111 = vector.extract_strided_slice %109 {offsets = [15, 0], sizes = [1, 32], strides = [1, 1]} : vector<16x32xf32> to vector<1x32xf32>
    %cst_38 = arith.constant 0.000000e+00 : f32
    %112 = vector.broadcast %cst_38 : f32 to vector<6x32xf32>
    %113 = tpu.concatenate %110, %111, %112 in 0 : vector<1x32xf32>, vector<1x32xf32>, vector<6x32xf32> -> vector<8x32xf32>
    %c320 = arith.constant 320 : index
    %c0_39 = arith.constant 0 : index
    %114 = vector.load %arg2[%c320, %c0_39] : memref<368x128xf32, #tpu.memory_space<vmem>>, vector<32x128xf32>
    %cst_40 = arith.constant dense<0.000000e+00> : vector<8x128xf32>
    %115 = tpu.matmul %113, %114, %cst_40 {dimension_numbers = #tpu.dot_dimension_numbers<[1], [0], [0], [1], [0, 0, 1, 1], [], []>} : vector<8x32xf32>, vector<32x128xf32>, vector<8x128xf32> -> vector<8x128xf32>
    %c360 = arith.constant 360 : index
    %c0_41 = arith.constant 0 : index
    %116 = vector.load %arg2[%c360, %c0_41] : memref<368x128xf32, #tpu.memory_space<vmem>>, vector<1x128xf32>
    %117 = vector.broadcast %116 : vector<1x128xf32> to vector<8x128xf32>
    %118 = arith.addf %115, %117 : vector<8x128xf32>
    %c0_42 = arith.constant 0 : index
    %c0_43 = arith.constant 0 : index
    %119 = vector.load %arg3[%c0_42, %c0_43] : memref<8x128xf32, #tpu.memory_space<vmem>>, vector<8x128xf32>
    tpu.vector_store %arg3[%c0_42, %c0_43], %118 {strides = array<i32>} : memref<8x128xf32, #tpu.memory_space<vmem>>, vector<8x128xf32>,
    return
  }
}

</mosaic_0001>

<bundles_post_ra>
// kernel: forward.1
= control target key start
LH: loop header
LB: loop body
LE: loop exit
PB: predicated region body
PF: predicated region fallthrough
CT: control target
= control target key end

     0   :  { %8 = vsyncpa [#allocation3], 0  ;;  %s593_s15 = smov [#allocation2]   ;;  %s594_s17 = smov 128   ;;  %s688_s0 = inlined_call_operand.vmem [shape: s32[16,1], index: 0, kind: input, shape index: {}]   ;;  %s689_s1 = inlined_call_operand.vmem [shape: s32[1,16], index: 1, kind: input, shape index: {}]   ;;  %s690_s2 = inlined_call_operand.hbm [shape: f32[368,128], index: 2, kind: input, shape index: {}]   ;;  %s691_s3 = inlined_call_operand.vmem [shape: f32[8,128], index: 3, kind: output, shape index: {}]  }
   0x1   :  { %s17_s14 = sshll.u32 %s690_s2, 4  ;;  %s19_s16 = sshll.u32 %s593_s15, 4  ;;  %s18_s14 = int_to_ptr.hbm [resolvable:$true] %s17_s14  ;;  %s20_s16 = int_to_ptr.vmem [resolvable:$true] %s19_s16 }
   0x2   :  { %s595_s18 = smov 8  }
   0x3   :  { %25 = dma.hbm_to_vmem [thread:$0]  %s18_s14, 5888, %s20_s16, [#allocation3], %s594_s17, %s594_s17, %s595_s18  }
   0x4   :  { %591 = dma.done.wait [#allocation3], 5888  }
   0x5   :  { %592 = vsyncadd [#allocation3], 4294961408  ;;  %v596_v0 = vmov 0   ;;  %v30_v1 = vld [vmem:[%s688_s0] sm:$0xff]  ;;  %v55_v2 = vld [vmem:[#allocation2 + $0x38] sm:$0xff]  ;;  %v34_v19 = vlaneseq  ;;  %vm56_vm0 = vcmask 523264  }
   0x6   :  { %534 = vset.pattern.permute.xlu0 %v596_v0  ;;  %v54_v3 = vld [vmem:[#allocation2 + $0x30] sm:$0xff]  ;;  %71 = vmatpush.msra.mxu0 %v55_v2  ;;  %v53_v4 = vld [vmem:[#allocation2 + $0x28] sm:$0xff]  ;;  %v52_v5 = vld [vmem:[#allocation2 + $0x20] sm:$0xff]  ;;  %v597_v27 = vmov 0.0   ;;  %s599_s22 = smov 64   ;;  %vm133_vm3 = vcmask 261120  }
   0x7   :  { %37 = vperm.xlu0 %534, %v30_v1   ;;  %v31_v6 = vld [vmem:[%s688_s0 + $0x8] sm:$0xff]  ;;  %v51_v7 = vld [vmem:[#allocation2 + $0x18] sm:$0xff]  ;;  %v50_v8 = vld [vmem:[#allocation2 + $0x10] sm:$0xff]  ;;  %v631_v22 = vand.u32 127, %v34_v19  ;;  %s598_s0 = smov 96   ;;  %v166_v48 = vshrl.u32 %v34_v19, 7 }
   0x8   :  { %72 = vmatpush.msra.mxu0 %v54_v3  ;;  %v49_v9 = vld [vmem:[#allocation2 + $0x8] sm:$0xff]  ;;  %v48_v10 = vld [vmem:[#allocation2] sm:$0xff]  ;;  %v101_v11 = vld [vmem:[#allocation2 + $0xb8] sm:$0xff]  ;;  %vm180_vm8 = vcmask 130048  }
   0x9   :  { %v100_v12 = vld [vmem:[#allocation2 + $0xb0] sm:$0xff]  ;;  %104 = vmatpush.msra.mxu1 %v101_v11  ;;  %v99_v13 = vld [vmem:[#allocation2 + $0xa8] sm:$0xff]  ;;  %v98_v14 = vld [vmem:[#allocation2 + $0xa0] sm:$0xff]  ;;  %v168_v51 = vshra.s32 %v166_v48, 3  ;;  %v170_v52 = vshra.s32 %v631_v22, 3  ;;  %v167_v53 = vadd.s32 8, %v166_v48 }
   0xa   :  { %73 = vmatpush.msra.mxu0 %v53_v4  ;;  %v97_v15 = vld [vmem:[#allocation2 + $0x98] sm:$0xff]  ;;  %v96_v16 = vld [vmem:[#allocation2 + $0x90] sm:$0xff]  ;;  %v95_v17 = vld [vmem:[#allocation2 + $0x88] sm:$0xff] }
   0xb   :  { %105 = vmatpush.msra.mxu1 %v100_v12  ;;  %v94_v18 = vld [vmem:[#allocation2 + $0x80] sm:$0xff]  ;;  %v93_v20 = vld [vmem:[#allocation2 + $0x78] sm:$0xff]  ;;  %v92_v21 = vld [vmem:[#allocation2 + $0x70] sm:$0xff]  ;;  %vm171_vm6 = vcmp.eq.s32.totalorder %v168_v51, %v170_v52  ;;  %v169_v54 = vshra.s32 %v167_v53, 3 }
   0xc   :  { %74 = vmatpush.msra.mxu0 %v52_v5  ;;  %v91_v23 = vld [vmem:[#allocation2 + $0x68] sm:$0xff]  ;;  %v90_v24 = vld [vmem:[#allocation2 + $0x60] sm:$0xff]  ;;  %v89_v26 = vld [vmem:[#allocation2 + $0x58] sm:$0xff] }
   0xd   :  { %106 = vmatpush.msra.mxu1 %v99_v13  ;;  %v88_v29 = vld [vmem:[#allocation2 + $0x50] sm:$0xff]  ;;  %v87_v30 = vld [vmem:[#allocation2 + $0x48] sm:$0xff]  ;;  %v86_v33 = vld [vmem:[#allocation2 + $0x40] sm:$0xff]  ;;  %vm172_vm9 = vcmp.eq.s32.totalorder %v169_v54, %v170_v52 }
   0xe   :  { %75 = vmatpush.msra.mxu0 %v51_v7  ;;  %v540_v37 = vld [vmem:[#allocation2 + $0x160] ss:$0 sm:$0xff]  ;;  %v241_v7 = vld [vmem:[#allocation2 + $0xd8] sm:$0xff]  ;;  %v541_v19 = vld [vmem:[#allocation2 + $0x161] ss:$0 sm:$0xff] }
   0xf   :  { %40 = vperm.xlu0 %534, %v31_v6   ;;  %107 = vmatpush.msra.mxu1 %v98_v14  ;;  %v32_v47 = vld [vmem:[%s689_s1] sm:$0x1]  ;;  %v378_v52 = vld [vmem:[#allocation2 + $0x138] sm:$0xff]  ;;  %v377_v53 = vld [vmem:[#allocation2 + $0x130] sm:$0xff] }
  0x10   :  { %76 = vmatpush.msra.mxu0 %v50_v8  ;;  %vm33_vm4 = vcmp.gt.s32.totalorder %v32_v47, 0  ;;  %v240_v8 = vld [vmem:[#allocation2 + $0xd0] sm:$0xff]  ;;  %v335_v47 = vld [vmem:[#allocation2 + $0xe8] sm:$0xff]  ;;  %v334_v48 = vld [vmem:[#allocation2 + $0xe0] sm:$0xff] }
  0x11   :  { %108 = vmatpush.msra.mxu1 %v97_v15  ;;  %v173_v49 = vsel %vm33_vm4, 1, %v596_v0  ;;  %v376_v54 = vld [vmem:[#allocation2 + $0x128] sm:$0xff] }
  0x12   :  { %77 = vmatpush.msra.mxu0 %v49_v9  ;;  %v174_v50 = vperm.slane %v173_v49, 0  ;;  %v239_v9 = vld [vmem:[#allocation2 + $0xc8] sm:$0xff] }
  0x13   :  { %109 = vmatpush.msra.mxu1 %v96_v16 }
  0x14   :  { %78 = vmatpush.msra.mxu0 %v48_v10  ;;  %vm175_vm5 = vcmp.eq.s32.totalorder %v174_v50, 1  ;;  %v238_v10 = vld [vmem:[#allocation2 + $0xc0] sm:$0xff] }
  0x15   :  { %110 = vmatpush.msra.mxu1 %v95_v17  ;;  %vm176_vm7 = vmand %vm171_vm6, %vm175_vm5 }
  0x16   :  { %vm177_vm10 = vmand %vm172_vm9, %vm175_vm5  ;;  %395 = vmatpush.msrb.mxu0 %v378_v52  ;;  %vm470_vm9 = vcmask 1040384  }
  0x17   :  { %111 = vmatpush.msra.mxu1 %v94_v18 }
  0x18   :  { %396 = vmatpush.msrb.mxu0 %v377_v53  ;;  %v475_v53 = vld [vmem:[#allocation2 + $0x148] sm:$0xff] }
  0x19   :  { %112 = vmatpush.msra.mxu1 %v93_v20 }
  0x1a   :  { %397 = vmatpush.msrb.mxu0 %v376_v54  ;;  %v474_v54 = vld [vmem:[#allocation2 + $0x140] sm:$0xff] }
  0x1b   :  { %113 = vmatpush.msra.mxu1 %v92_v21 }
  0x1d   :  { %114 = vmatpush.msra.mxu1 %v91_v23 }
  0x1f   :  { %115 = vmatpush.msra.mxu1 %v90_v24 }
  0x21   :  { %116 = vmatpush.msra.mxu1 %v89_v26 }
  0x23   :  { %117 = vmatpush.msra.mxu1 %v88_v29 }
  0x25   :  { %118 = vmatpush.msra.mxu1 %v87_v30 }
  0x27   :  { %119 = vmatpush.msra.mxu1 %v86_v33 }
  0x79   :  { %v38_v25 = vpop.permute.xlu0 %37 }
  0x7a   :  { %vm42_vm1 = vcmp.eq.s32.totalorder %v631_v22, %v38_v25 }
  0x7b   :  { %v509_v28 = vsel %vm42_vm1, 1.0, %v597_v27 }
  0x7c   :  { %511 = vmatmul.msk.f32.vlgmr.msra.gmra.mxu0 %vm56_vm0, %v509_v28  ;;  %v600_v28 = vmov 32.0  }
  0x81   :  { %v41_v31 = vpop.permute.xlu0 %40 }
  0x82   :  { %vm43_vm2 = vcmp.eq.s32.totalorder %v631_v22, %v41_v31 }
  0x83   :  { %v510_v32 = vsel %vm43_vm2, 1.0, %v597_v27 }
  0x84   :  { %512 = vmatmul.msk.f32.gmra.mxu0 %vm56_vm0, %v510_v32 }
  0xf9   :  { %v637_v34 = vpop.f32.mrf.mxu0 }
  0xfa   :  { %120 = vmatmul.f32.vlgmr.msra.gmra.mxu1 %v637_v34 }
 0x101   :  { %v640_v35 = vpop.f32.mrf.mxu0 }
 0x102   :  { %123 = vmatmul.f32.gmra.mxu1 %v640_v35 }
 0x177   :  { %v121_v36 = vpop.f32.mrf.mxu1 }
 0x178   :  { %v122_v40 = vadd.f32 %v540_v37, %v121_v36 }
 0x17f   :  { %v124_v38 = vpop.f32.mrf.mxu1 }
 0x180   :  { %v125_v39 = vadd.f32 %v540_v37, %v124_v38 }
 0x182   :  { %131 = vrot.lane.b32.xlu1 %v125_v39, %s598_s0  ;;  %v535_v41 = vpack.i.bf16 %v122_v40, %v125_v39 }
 0x18a   :  { %129 = vrot.lane.b32.xlu1 %v122_v40, %s598_s0 }
 0x192   :  { %536 = vrot.lane.b32.xlu1 %v535_v41, %s599_s22 }
 0x1f4   :  { %v132_v42 = vpop.permute.xlu1 %131 }
 0x1f5   :  { %513 = vmatpush.xpose.msk.msra.mxu2 %vm133_vm3, %v132_v42 }
 0x1fc   :  { %v130_v43 = vpop.permute.xlu1 %129 }
 0x1fd   :  { %514 = vmatpush.xpose.msk.msra.mxu2 %vm133_vm3, %v130_v43 }
 0x200   :  { %515 = vmatmul.msk.f32.vlgmr.msra.gmra.mxu2 %vm133_vm3, %v122_v40 }
 0x204   :  { %v537_v44 = vpop.permute.xlu1 %536 }
 0x205   :  { %v538_v45 = vunpack.i.l.bf16 %v537_v44  ;;  %v539_v46 = vunpack.i.h.bf16 %v537_v44 }
 0x207   :  { %229 = vmatpush.msra.mxu3 %v538_v45  ;;  %v337_v45 = vld [vmem:[#allocation2 + $0xf8] sm:$0xff] }
 0x208   :  { %516 = vmatmul.msk.f32.gmra.mxu2 %vm133_vm3, %v125_v39 }
 0x209   :  { %230 = vmatpush.msra.mxu3 %v539_v46  ;;  %358 = vmatpush.msrb.mxu2 %v337_v45  ;;  %v336_v46 = vld [vmem:[#allocation2 + $0xf0] sm:$0xff] }
 0x20b   :  { %262 = vmatpush.msrb.mxu3 %v241_v7  ;;  %359 = vmatpush.msrb.mxu2 %v336_v46 }
 0x20d   :  { %263 = vmatpush.msrb.mxu3 %v240_v8  ;;  %360 = vmatpush.msrb.mxu2 %v335_v47 }
 0x20f   :  { %264 = vmatpush.msrb.mxu3 %v239_v9  ;;  %361 = vmatpush.msrb.mxu2 %v334_v48  ;;  %v543_v9 = vld [vmem:[#allocation2 + $0x165] ss:$0 sm:$0xff] }
 0x211   :  { %265 = vmatpush.msrb.mxu3 %v238_v10 }
 0x283   :  { %v159_v55 = vpop.f32.mrf.mxu2 }
 0x284   :  { %v178_v56 = vsel %vm176_vm7, %v159_v55, -1e+09 }
 0x285   :  { %v181_v57 = vsel %vm180_vm8, %v178_v56, -inf }
 0x286   :  { %182 = vmax.xlane.f32.xlu2 %v181_v57  ;;  %v375_v57 = vld [vmem:[#allocation2 + $0x120] sm:$0xff] }
 0x287   :  { %398 = vmatpush.msrb.mxu0 %v375_v57 }
 0x28b   :  { %v162_v58 = vpop.f32.mrf.mxu2 }
 0x28c   :  { %v179_v59 = vsel %vm177_vm10, %v162_v58, -1e+09  ;;  %vm472_vm10 = vcmask 1041408  }
 0x28d   :  { %v184_v60 = vsel %vm180_vm8, %v179_v59, -inf }
 0x28e   :  { %185 = vmax.xlane.f32.xlu2 %v184_v60  ;;  %v374_v60 = vld [vmem:[#allocation2 + $0x118] sm:$0xff] }
 0x28f   :  { %399 = vmatpush.msrb.mxu0 %v374_v60 }
 0x2f9   :  { %v183_v61 = vpop.xlane.xlu2 %182 }
 0x2fa   :  { %v187_v62 = vsub.f32 %v178_v56, %v183_v61 }
 0x2fc   :  { %v189_v63 = vmul.f32 1.442695, %v187_v62  ;;  %v373_v62 = vld [vmem:[#allocation2 + $0x110] sm:$0xff] }
 0x2fd   :  { %400 = vmatpush.msrb.mxu0 %v373_v62 }
 0x2fe   :  { %549 = vpow2.f32 %v189_v63 }
 0x301   :  { %v186_v0 = vpop.xlane.xlu2 %185 }
 0x302   :  { %v188_v1 = vsub.f32 %v179_v59, %v186_v0 }
 0x304   :  { %v550_v2 = vpop.eup %549  ;;  %v191_v3 = vmul.f32 1.442695, %v188_v1 }
 0x305   :  { %v193_v4 = vsel %vm180_vm8, %v550_v2, 0.0 }
 0x306   :  { %551 = vpow2.f32 %v191_v3  ;;  %194 = vadd.xlane.f32.xlu0 %v193_v4 }
 0x30c   :  { %v552_v5 = vpop.eup %551 }
 0x30d   :  { %v196_v6 = vsel %vm180_vm8, %v552_v5, 0.0 }
 0x30e   :  { %197 = vadd.xlane.f32.xlu2 %v196_v6 }
 0x379   :  { %v195_v11 = vpop.xlane.xlu0 %194 }
 0x37a   :  { %553 = vrcp.f32 %v195_v11 }
 0x380   :  { %v554_v12 = vpop.eup %553 }
 0x381   :  { %v198_v13 = vpop.xlane.xlu2 %197  ;;  %v201_v14 = vmul.f32 %v554_v12, %v550_v2 }
 0x382   :  { %555 = vrcp.f32 %v198_v13 }
 0x383   :  { %517 = vmatmul.msk.f32.vlgmr.msra.gmra.mxu3 %vm180_vm8, %v201_v14  ;;  %557 = vrcp.f32 %v600_v28  ;;  %v545_v28 = vld [vmem:[#allocation2 + $0x163] ss:$0 sm:$0xff] }
 0x388   :  { %v556_v15 = vpop.eup %555 }
 0x389   :  { %v202_v16 = vmul.f32 %v556_v15, %v552_v5  ;;  %v558_v29 = vpop.eup %557  ;;  %v542_v5 = vld [vmem:[#allocation2 + $0x164] ss:$0 sm:$0xff] }
 0x38a   :  { %v282_v30 = vmul.f32 32.0, %v558_v29  ;;  %vm286_vm11 = vweird.f32 %v558_v29 }
 0x38b   :  { %518 = vmatmul.msk.f32.gmra.mxu3 %vm180_vm8, %v202_v16 }
 0x38c   :  { %v283_v31 = vsub.f32 1.0, %v282_v30 }
 0x38e   :  { %v284_v32 = vmul.f32 %v558_v29, %v283_v31 }
 0x390   :  { %v285_v33 = vadd.f32 %v558_v29, %v284_v32 }
 0x392   :  { %v664_v36 = vsel %vm286_vm11, %v558_v29, %v285_v33 }
 0x406   :  { %v232_v17 = vpop.f32.mrf.mxu3 }
 0x407   :  { %519 = vmatmul.msk.f32.vlgmr.msrb.gmra.mxu3 %vm133_vm3, %v232_v17 }
 0x40e   :  { %v235_v18 = vpop.f32.mrf.mxu3 }
 0x40f   :  { %520 = vmatmul.msk.f32.gmra.mxu3 %vm133_vm3, %v235_v18 }
 0x48a   :  { %v267_v20 = vpop.f32.mrf.mxu3 }
 0x48b   :  { %v268_v21 = vadd.f32 %v541_v19, %v267_v20  ;;  %v371_v20 = vld [vmem:[#allocation2 + $0x100] sm:$0xff] }
 0x48d   :  { %v273_v22 = vadd.f32 %v268_v21, %v637_v34  ;;  %v544_v21 = vld [vmem:[#allocation2 + $0x162] ss:$0 sm:$0xff] }
 0x48f   :  { %v275_v23 = vsel %vm133_vm3, %v273_v22, 0.0 }
 0x490   :  { %276 = vadd.xlane.f32.xlu1 %v275_v23 }
 0x492   :  { %v270_v24 = vpop.f32.mrf.mxu3 }
 0x493   :  { %v271_v25 = vadd.f32 %v541_v19, %v270_v24  ;;  %v372_v19 = vld [vmem:[#allocation2 + $0x108] sm:$0xff] }
 0x494   :  { %401 = vmatpush.msrb.mxu0 %v372_v19  ;;  %v548_v19 = vld [vmem:[#allocation2 + $0x168] ss:$0 sm:$0xff] }
 0x495   :  { %v274_v26 = vadd.f32 %v271_v25, %v640_v35 }
 0x496   :  { %402 = vmatpush.msrb.mxu0 %v371_v20 }
 0x497   :  { %v278_v27 = vsel %vm133_vm3, %v274_v26, 0.0 }
 0x498   :  { %279 = vadd.xlane.f32.xlu2 %v278_v27 }
 0x503   :  { %v277_v34 = vpop.xlane.xlu1 %276 }
 0x504   :  { %v288_v37 = vmul.f32 %v664_v36, %v277_v34 }
 0x506   :  { %v290_v38 = vsub.f32 %v273_v22, %v288_v37 }
 0x508   :  { %v292_v39 = vmul.f32 %v290_v38, %v290_v38 }
 0x50a   :  { %v294_v35 = vsel %vm133_vm3, %v292_v39, 0.0 }
 0x50b   :  { %v280_v40 = vpop.xlane.xlu2 %279  ;;  %295 = vadd.xlane.f32.xlu2 %v294_v35 }
 0x50c   :  { %v289_v41 = vmul.f32 %v664_v36, %v280_v40 }
 0x50e   :  { %v291_v42 = vsub.f32 %v274_v26, %v289_v41 }
 0x510   :  { %v293_v43 = vmul.f32 %v291_v42, %v291_v42 }
 0x512   :  { %v297_v44 = vsel %vm133_vm3, %v293_v43, 0.0 }
 0x513   :  { %298 = vadd.xlane.f32.xlu2 %v297_v44 }
 0x57e   :  { %v296_v49 = vpop.xlane.xlu2 %295 }
 0x57f   :  { %v300_v50 = vmul.f32 %v296_v49, %v664_v36 }
 0x581   :  { %v302_v51 = vadd.f32 1e-05, %v300_v50  ;;  %v477_v50 = vld [vmem:[#allocation2 + $0x158] sm:$0xff] }
 0x582   :  { %495 = vmatpush.msra.mxu3 %v477_v50 }
 0x583   :  { %559 = vrsqrt.f32 %v302_v51  ;;  %vm310_vm13 = vweird.f32 %v302_v51 }
 0x586   :  { %v299_v55 = vpop.xlane.xlu2 %298 }
 0x587   :  { %v301_v56 = vmul.f32 %v299_v55, %v664_v36 }
 0x589   :  { %v560_v58 = vpop.eup %559  ;;  %v303_v59 = vadd.f32 1e-05, %v301_v56 }
 0x58a   :  { %v305_v61 = vmul.f32 %v560_v58, %v302_v51  ;;  %vm311_vm12 = vweird.f32 %v560_v58  ;;  %v476_v51 = vld [vmem:[#allocation2 + $0x150] sm:$0xff] }
 0x58b   :  { %561 = vrsqrt.f32 %v303_v59  ;;  %vm312_vm14 = vmor %vm310_vm13, %vm311_vm12  ;;  %vm320_vm1 = vweird.f32 %v303_v59  ;;  %496 = vmatpush.msra.mxu3 %v476_v51 }
 0x58c   :  { %v306_v63 = vmul.f32 %v560_v58, %v305_v61 }
 0x58d   :  { %497 = vmatpush.msra.mxu3 %v475_v53 }
 0x58e   :  { %v307_v0 = vmul.f32 0.5, %v306_v63 }
 0x58f   :  { %498 = vmatpush.msra.mxu3 %v474_v54 }
 0x590   :  { %v308_v1 = vsub.f32 1.5, %v307_v0 }
 0x591   :  { %v562_v2 = vpop.eup %561 }
 0x592   :  { %v309_v3 = vmul.f32 %v560_v58, %v308_v1  ;;  %v315_v4 = vmul.f32 %v562_v2, %v303_v59  ;;  %vm321_vm15 = vweird.f32 %v562_v2 }
 0x593   :  { %vm322_vm2 = vmor %vm320_vm1, %vm321_vm15 }
 0x594   :  { %v313_v6 = vsel %vm312_vm14, %v560_v58, %v309_v3  ;;  %v316_v7 = vmul.f32 %v562_v2, %v315_v4 }
 0x595   :  { %v324_v8 = vmul.f32 %v313_v6, %v290_v38 }
 0x596   :  { %v317_v10 = vmul.f32 0.5, %v316_v7 }
 0x597   :  { %v328_v11 = vmul.f32 %v542_v5, %v324_v8 }
 0x598   :  { %v318_v12 = vsub.f32 1.5, %v317_v10 }
 0x599   :  { %v332_v13 = vadd.f32 %v543_v9, %v328_v11 }
 0x59a   :  { %v319_v14 = vmul.f32 %v562_v2, %v318_v12 }
 0x59b   :  { %521 = vmatmul.msk.f32.vlgmr.msrb.gmra.mxu2 %vm133_vm3, %v332_v13 }
 0x59c   :  { %v323_v15 = vsel %vm322_vm2, %v562_v2, %v319_v14 }
 0x59d   :  { %v325_v16 = vmul.f32 %v323_v15, %v291_v42 }
 0x59f   :  { %v329_v17 = vmul.f32 %v542_v5, %v325_v16  ;;  %v546_v5 = vld [vmem:[#allocation2 + $0x166] ss:$0 sm:$0xff] }
 0x5a1   :  { %v333_v18 = vadd.f32 %v543_v9, %v329_v17  ;;  %v547_v9 = vld [vmem:[#allocation2 + $0x167] ss:$0 sm:$0xff] }
 0x5a3   :  { %522 = vmatmul.msk.f32.gmra.mxu2 %vm133_vm3, %v333_v18 }
 0x61e   :  { %v363_v22 = vpop.f32.mrf.mxu2 }
 0x61f   :  { %v364_v23 = vadd.f32 %v544_v21, %v363_v22 }
 0x621   :  { %v369_v24 = vmax.f32 %v364_v23, 0.0 }
 0x623   :  { %523 = vmatmul.msk.f32.vlgmr.msrb.gmra.mxu0 %vm56_vm0, %v369_v24 }
 0x626   :  { %v366_v25 = vpop.f32.mrf.mxu2 }
 0x627   :  { %v367_v26 = vadd.f32 %v544_v21, %v366_v25 }
 0x629   :  { %v370_v27 = vmax.f32 %v367_v26, 0.0 }
 0x62b   :  { %524 = vmatmul.msk.f32.gmra.mxu0 %vm56_vm0, %v370_v27 }
 0x6a0   :  { %v404_v29 = vpop.f32.mrf.mxu0 }
 0x6a1   :  { %v405_v30 = vadd.f32 %v545_v28, %v404_v29 }
 0x6a3   :  { %v410_v31 = vadd.f32 %v405_v30, %v332_v13 }
 0x6a5   :  { %v412_v32 = vsel %vm133_vm3, %v410_v31, 0.0 }
 0x6a6   :  { %413 = vadd.xlane.f32.xlu2 %v412_v32 }
 0x6a8   :  { %v407_v33 = vpop.f32.mrf.mxu0 }
 0x6a9   :  { %v408_v34 = vadd.f32 %v545_v28, %v407_v33 }
 0x6ab   :  { %v411_v37 = vadd.f32 %v408_v34, %v333_v18 }
 0x6ad   :  { %v415_v38 = vsel %vm133_vm3, %v411_v37, 0.0 }
 0x6ae   :  { %416 = vadd.xlane.f32.xlu2 %v415_v38 }
 0x719   :  { %v414_v39 = vpop.xlane.xlu2 %413 }
 0x71a   :  { %v418_v35 = vmul.f32 %v414_v39, %v664_v36 }
 0x71c   :  { %v420_v40 = vsub.f32 %v410_v31, %v418_v35 }
 0x71e   :  { %v422_v41 = vmul.f32 %v420_v40, %v420_v40 }
 0x720   :  { %v424_v42 = vsel %vm133_vm3, %v422_v41, 0.0 }
 0x721   :  { %425 = vadd.xlane.f32.xlu0 %v424_v42  ;;  %v417_v43 = vpop.xlane.xlu2 %416 }
 0x722   :  { %v419_v44 = vmul.f32 %v417_v43, %v664_v36 }
 0x724   :  { %v421_v45 = vsub.f32 %v411_v37, %v419_v44 }
 0x726   :  { %v423_v46 = vmul.f32 %v421_v45, %v421_v45 }
 0x728   :  { %v427_v47 = vsel %vm133_vm3, %v423_v46, 0.0 }
 0x729   :  { %428 = vadd.xlane.f32.xlu2 %v427_v47 }
 0x794   :  { %v426_v48 = vpop.xlane.xlu0 %425 }
 0x795   :  { %v430_v49 = vmul.f32 %v426_v48, %v664_v36 }
 0x797   :  { %v432_v52 = vadd.f32 1e-05, %v430_v49 }
 0x799   :  { %563 = vrsqrt.f32 %v432_v52  ;;  %vm440_vm4 = vweird.f32 %v432_v52 }
 0x79c   :  { %v429_v55 = vpop.xlane.xlu2 %428 }
 0x79d   :  { %v431_v56 = vmul.f32 %v429_v55, %v664_v36 }
 0x79f   :  { %v564_v57 = vpop.eup %563  ;;  %v433_v58 = vadd.f32 1e-05, %v431_v56 }
 0x7a0   :  { %v435_v59 = vmul.f32 %v564_v57, %v432_v52  ;;  %vm441_vm0 = vweird.f32 %v564_v57 }
 0x7a1   :  { %565 = vrsqrt.f32 %v433_v58  ;;  %vm442_vm5 = vmor %vm440_vm4, %vm441_vm0  ;;  %vm450_vm7 = vweird.f32 %v433_v58 }
 0x7a2   :  { %v436_v60 = vmul.f32 %v564_v57, %v435_v59 }
 0x7a4   :  { %v437_v61 = vmul.f32 0.5, %v436_v60 }
 0x7a6   :  { %v438_v62 = vsub.f32 1.5, %v437_v61 }
 0x7a7   :  { %v566_v63 = vpop.eup %565 }
 0x7a8   :  { %v439_v0 = vmul.f32 %v564_v57, %v438_v62  ;;  %v445_v1 = vmul.f32 %v566_v63, %v433_v58  ;;  %vm451_vm6 = vweird.f32 %v566_v63 }
 0x7a9   :  { %vm452_vm8 = vmor %vm450_vm7, %vm451_vm6 }
 0x7aa   :  { %v443_v2 = vsel %vm442_vm5, %v564_v57, %v439_v0  ;;  %v446_v3 = vmul.f32 %v566_v63, %v445_v1 }
 0x7ab   :  { %v454_v6 = vmul.f32 %v443_v2, %v420_v40 }
 0x7ac   :  { %v447_v4 = vmul.f32 0.5, %v446_v3 }
 0x7ad   :  { %v458_v8 = vmul.f32 %v546_v5, %v454_v6 }
 0x7ae   :  { %v448_v7 = vsub.f32 1.5, %v447_v4 }
 0x7af   :  { %v462_v13 = vadd.f32 %v547_v9, %v458_v8 }
 0x7b0   :  { %v449_v36 = vmul.f32 %v566_v63, %v448_v7 }
 0x7b1   :  { %v465_v15 = vrot.slane %v462_v13, 7 }
 0x7b2   :  { %v453_v10 = vsel %vm452_vm8, %v566_v63, %v449_v36 }
 0x7b3   :  { %v455_v11 = vmul.f32 %v453_v10, %v421_v45 }
 0x7b5   :  { %v459_v12 = vmul.f32 %v546_v5, %v455_v11 }
 0x7b7   :  { %v463_v14 = vadd.f32 %v547_v9, %v459_v12 }
 0x7b9   :  { %v468_v16 = vrot.slane %v463_v14, 6 }
 0x7bb   :  { %v471_v17 = vsel %vm470_vm9, %v465_v15, %v468_v16 }
 0x7bc   :  { %v473_v18 = vsel %vm472_vm10, %v471_v17, 0.0 }
 0x7bd   :  { %525 = vmatmul.msk.f32.vlgmr.msra.gmra.mxu3 %vm133_vm3, %v473_v18 }
 0x840   :  { %v500_v20 = vpop.f32.mrf.mxu3 }
 0x841   :  { %v501_v21 = vadd.f32 %v548_v19, %v500_v20 }
 0x843   :  { %503 = vst [vmem:[%s691_s3] sm:$0xff] %v501_v21 }
 0x844   :  { %508 = vsyncpa [#allocation3], 1 }

</bundles_post_ra>
